<compile_context>
chip_gen: v5e
topology: v5e:2x2
jax: 0.10.0
libtpu: 0.0.40
codegen_flags: <defaults>
</compile_context>

<pallas_src>
import jax
import jax.numpy as jnp
from jax.experimental import pallas as pl
from jax.experimental.pallas import tpu as pltpu


def _round_up(n, m):
    return ((n + m - 1) // m) * m


def _vae_kernel(
    x_ref, eps_ref,
    w1_ref, b1_ref,
    w2_ref, b2_ref,
    w3_ref, b3_ref,        # fused [mu | logvar] projection: (64, 2L)
    w4_ref, b4_ref,
    w5_ref, b5_ref,
    w6_ref, b6_ref,
    out_ref,               # lane-dense slab (TB, D_in + 2L) = [recon | mu | logvar]
):
    L = eps_ref.shape[-1]

    x = x_ref[...]
    eps = eps_ref[...]

    def dense(h, w_ref, b_ref):
        # bf16 MXU operands, f32 accumulation; bias add stays on the f32 path.
        return (
            jnp.dot(h.astype(w_ref.dtype), w_ref[...],
                    preferred_element_type=jnp.float32)
            + b_ref[...].astype(jnp.float32)
        )

    # ---- encode ----
    h1 = jnp.maximum(dense(x, w1_ref, b1_ref), 0.0)
    h2 = jnp.maximum(dense(h1, w2_ref, b2_ref), 0.0)
    mulv = dense(h2, w3_ref, b3_ref)          # (TB, 2L): [mu | logvar]
    mu = mulv[:, :L]
    logvar = mulv[:, L:]

    # ---- reparameterize (f32 elementwise; EUP exp) ----
    std = jnp.exp(0.5 * logvar)
    z = mu + eps * std

    # ---- decode ----
    h4 = jnp.maximum(dense(z, w4_ref, b4_ref), 0.0)
    h5 = jnp.maximum(dense(h4, w5_ref, b5_ref), 0.0)
    recon = jnp.tanh(dense(h5, w6_ref, b6_ref))

    # Single lane-dense store instead of three narrow masked stores.
    out_ref[...] = jnp.concatenate([recon, mulv], axis=-1).astype(out_ref.dtype)


def deep_vec_vae_forward(x, eps, params, *, block_b=512):
    """Full VAE forward (encode -> reparameterize -> decode) in one Pallas call.

    x:   (B, input_space) float32
    eps: (B, latent_space) float32 standard-normal noise
    params: dict of f32 weights stored pre-transposed (in, out) + (1, out) biases
    returns (recon, mu, logvar), each f32
    """
    B, D_in = x.shape
    L = eps.shape[-1]
    D_out = D_in + 2 * L

    # Fused latent projection [mu | logvar].
    w3 = jnp.concatenate([params["w31"], params["w32"]], axis=1)
    b3 = jnp.concatenate([params["b31"], params["b32"]], axis=1)

    bf16 = jnp.bfloat16
    weights = (
        params["w1"].astype(bf16), params["b1"],
        params["w2"].astype(bf16), params["b2"],
        w3.astype(bf16), b3,
        params["w4"].astype(bf16), params["b4"],
        params["w5"].astype(bf16), params["b5"],
        params["w6"].astype(bf16), params["b6"],
    )

    # Batch tile: MXU-friendly (multiple of 256 on v6e/v7x; 512 default) but
    # never larger than the 8-aligned batch itself.
    tb = min(block_b, _round_up(B, 8))
    B_pad = _round_up(B, tb)
    if B_pad != B:
        x = jnp.pad(x, ((0, B_pad - B), (0, 0)))
        eps = jnp.pad(eps, ((0, B_pad - B), (0, 0)))
    grid = (B_pad // tb,)

    def batch_spec(feat):
        # TODO(synk): if D_in grows large enough that x/recon DMA is exposed,
        # add pipeline_mode=pl.Buffered(3) here and re-budget VMEM for v7x.
        return pl.BlockSpec((tb, feat), lambda i: (i, 0))

    def resident_spec(arr):
        return pl.BlockSpec(arr.shape, lambda i: (0, 0))

    in_specs = [batch_spec(D_in), batch_spec(L)] + [resident_spec(w) for w in weights]

    flops = 2 * B_pad * (
        D_in * 128 + 128 * 64 + 64 * (2 * L) + L * 64 + 64 * 128 + 128 * D_in
    )
    transcendentals = B_pad * (L + D_in)
    bytes_accessed = (
        x.size * x.dtype.itemsize
        + eps.size * eps.dtype.itemsize
        + sum(w.size * w.dtype.itemsize for w in weights)
        + B_pad * D_out * 4
    )

    out = pl.pallas_call(
        _vae_kernel,
        out_shape=jax.ShapeDtypeStruct((B_pad, D_out), jnp.float32),
        grid=grid,
        in_specs=in_specs,
        out_specs=batch_spec(D_out),
        compiler_params=pltpu.CompilerParams(
            dimension_semantics=("parallel",),
        ),
        cost_estimate=pl.CostEstimate(
            flops=flops,
            transcendentals=transcendentals,
            bytes_accessed=bytes_accessed,
        ),
    )(x, eps, *weights)

    recon = out[:B, :D_in]
    mu = out[:B, D_in:D_in + L]
    logvar = out[:B, D_in + L:]
    return recon, mu, logvar


def _ref_forward(x, eps, params):
    """Pure-JAX reference mirroring the kernel's bf16-operand / f32-acc dots."""
    bf16 = jnp.bfloat16

    def dense(h, w, b):
        return jnp.dot(h.astype(bf16), w.astype(bf16),
                       preferred_element_type=jnp.float32) + b

    h1 = jnp.maximum(dense(x, params["w1"], params["b1"]), 0.0)
    h2 = jnp.maximum(dense(h1, params["w2"], params["b2"]), 0.0)
    mu = dense(h2, params["w31"], params["b31"])
    logvar = dense(h2, params["w32"], params["b32"])
    std = jnp.exp(0.5 * logvar)
    z = mu + eps * std
    h4 = jnp.maximum(dense(z, params["w4"], params["b4"]), 0.0)
    h5 = jnp.maximum(dense(h4, params["w5"], params["b5"]), 0.0)
    recon = jnp.tanh(dense(h5, params["w6"], params["b6"]))
    return recon, mu, logvar


def init_params(key, input_space, latent_space):
    """Deterministic synthetic init with PyTorch nn.Linear fan-in bounds,
    weights stored pre-transposed as (in, out)."""
    dims = {
        "1": (input_space, 128),
        "2": (128, 64),
        "31": (64, latent_space),
        "32": (64, latent_space),
        "4": (latent_space, 64),
        "5": (64, 128),
        "6": (128, input_space),
    }
    params = {}
    keys = jax.random.split(key, 2 * len(dims))
    for i, (name, (fan_in, fan_out)) in enumerate(dims.items()):
        bound = 1.0 / jnp.sqrt(jnp.float32(fan_in))
        params["w" + name] = jax.random.uniform(
            keys[2 * i], (fan_in, fan_out), jnp.float32, -bound, bound)
        params["b" + name] = jax.random.uniform(
            keys[2 * i + 1], (1, fan_out), jnp.float32, -bound, bound)
    return params


if __name__ == "__main__":
    INPUT_SPACE = 16
    LATENT_SPACE = 8
    BATCH = 8

    key = jax.random.PRNGKey(0)
    k_param, k_x, k_eps = jax.random.split(key, 3)

    params = init_params(k_param, INPUT_SPACE, LATENT_SPACE)
    x = jax.random.normal(k_x, (BATCH, INPUT_SPACE), jnp.float32)
    eps = jax.random.normal(k_eps, (BATCH, LATENT_SPACE), jnp.float32)

    recon, mu, logvar = deep_vec_vae_forward(x, eps, params)
    jax.block_until_ready((recon, mu, logvar))

    assert recon.shape == (BATCH, INPUT_SPACE)
    assert mu.shape == (BATCH, LATENT_SPACE)
    assert logvar.shape == (BATCH, LATENT_SPACE)

    r_ref, m_ref, lv_ref = _ref_forward(x, eps, params)
    assert jnp.allclose(recon, r_ref, atol=2e-3, rtol=2e-3)
    assert jnp.allclose(mu, m_ref, atol=2e-3, rtol=2e-3)
    assert jnp.allclose(logvar, lv_ref, atol=2e-3, rtol=2e-3)

    print("KERNEL_OK")
</pallas_src>

<mosaic_0001>
module attributes {stable_mosaic.version = 11 : i64} {
  func.func @_vae_kernel(%arg0: i32, %arg1: memref<8x16xf32, #tpu.memory_space<vmem>>, %arg2: memref<8x8xf32, #tpu.memory_space<vmem>>, %arg3: memref<16x128xbf16, #tpu.memory_space<vmem>>, %arg4: memref<1x128xf32, #tpu.memory_space<vmem>>, %arg5: memref<128x64xbf16, #tpu.memory_space<vmem>>, %arg6: memref<1x64xf32, #tpu.memory_space<vmem>>, %arg7: memref<64x16xbf16, #tpu.memory_space<vmem>>, %arg8: memref<1x16xf32, #tpu.memory_space<vmem>>, %arg9: memref<8x64xbf16, #tpu.memory_space<vmem>>, %arg10: memref<1x64xf32, #tpu.memory_space<vmem>>, %arg11: memref<64x128xbf16, #tpu.memory_space<vmem>>, %arg12: memref<1x128xf32, #tpu.memory_space<vmem>>, %arg13: memref<128x16xbf16, #tpu.memory_space<vmem>>, %arg14: memref<1x16xf32, #tpu.memory_space<vmem>>, %arg15: memref<8x32xf32, #tpu.memory_space<vmem>>) attributes {dimension_semantics = [#tpu.dimension_semantics<parallel>], iteration_bounds = array<i64: 1>, scalar_prefetch = 0 : i64, scratch_operands = 0 : i64, tpu.core_type = #tpu.core_type<tc>, window_params = [{transform_indices = @transform_0, window_bounds = array<i64: 8, 16>}, {transform_indices = @transform_1, window_bounds = array<i64: 8, 8>}, {pipeline_mode = #tpu.pipeline_mode<synchronous>, transform_indices = @transform_2, window_bounds = array<i64: 16, 128>}, {pipeline_mode = #tpu.pipeline_mode<synchronous>, transform_indices = @transform_3, window_bounds = array<i64: 1, 128>}, {pipeline_mode = #tpu.pipeline_mode<synchronous>, transform_indices = @transform_4, window_bounds = array<i64: 128, 64>}, {pipeline_mode = #tpu.pipeline_mode<synchronous>, transform_indices = @transform_5, window_bounds = array<i64: 1, 64>}, {pipeline_mode = #tpu.pipeline_mode<synchronous>, transform_indices = @transform_6, window_bounds = array<i64: 64, 16>}, {pipeline_mode = #tpu.pipeline_mode<synchronous>, transform_indices = @transform_7, window_bounds = array<i64: 1, 16>}, {pipeline_mode = #tpu.pipeline_mode<synchronous>, transform_indices = @transform_8, window_bounds = array<i64: 8, 64>}, {pipeline_mode = #tpu.pipeline_mode<synchronous>, transform_indices = @transform_9, window_bounds = array<i64: 1, 64>}, {pipeline_mode = #tpu.pipeline_mode<synchronous>, transform_indices = @transform_10, window_bounds = array<i64: 64, 128>}, {pipeline_mode = #tpu.pipeline_mode<synchronous>, transform_indices = @transform_11, window_bounds = array<i64: 1, 128>}, {pipeline_mode = #tpu.pipeline_mode<synchronous>, transform_indices = @transform_12, window_bounds = array<i64: 128, 16>}, {pipeline_mode = #tpu.pipeline_mode<synchronous>, transform_indices = @transform_13, window_bounds = array<i64: 1, 16>}, {transform_indices = @transform_14, window_bounds = array<i64: 8, 32>}]} {
    %c0 = arith.constant 0 : index
    %c0_0 = arith.constant 0 : index
    %0 = vector.load %arg1[%c0, %c0_0] : memref<8x16xf32, #tpu.memory_space<vmem>>, vector<8x16xf32>
    %c0_1 = arith.constant 0 : index
    %c0_2 = arith.constant 0 : index
    %1 = vector.load %arg2[%c0_1, %c0_2] : memref<8x8xf32, #tpu.memory_space<vmem>>, vector<8x8xf32>
    %2 = arith.truncf %0 : vector<8x16xf32> to vector<8x16xbf16>
    %c0_3 = arith.constant 0 : index
    %c0_4 = arith.constant 0 : index
    %3 = vector.load %arg3[%c0_3, %c0_4] : memref<16x128xbf16, #tpu.memory_space<vmem>>, vector<16x128xbf16>
    %cst = arith.constant dense<0.000000e+00> : vector<8x128xf32>
    %4 = tpu.matmul %2, %3, %cst {dimension_numbers = #tpu.dot_dimension_numbers<[1], [0], [0], [1], [0, 0, 1, 1], [], []>} : vector<8x16xbf16>, vector<16x128xbf16>, vector<8x128xf32> -> vector<8x128xf32>
    %c0_5 = arith.constant 0 : index
    %c0_6 = arith.constant 0 : index
    %5 = vector.load %arg4[%c0_5, %c0_6] : memref<1x128xf32, #tpu.memory_space<vmem>>, vector<1x128xf32>
    %6 = vector.broadcast %5 : vector<1x128xf32> to vector<8x128xf32>
    %7 = arith.addf %4, %6 : vector<8x128xf32>
    %cst_7 = arith.constant 0.000000e+00 : f32
    %8 = vector.broadcast %cst_7 : f32 to vector<8x128xf32>
    %9 = arith.maximumf %7, %8 : vector<8x128xf32>
    %10 = arith.truncf %9 : vector<8x128xf32> to vector<8x128xbf16>
    %c0_8 = arith.constant 0 : index
    %c0_9 = arith.constant 0 : index
    %11 = vector.load %arg5[%c0_8, %c0_9] : memref<128x64xbf16, #tpu.memory_space<vmem>>, vector<128x64xbf16>
    %cst_10 = arith.constant dense<0.000000e+00> : vector<8x64xf32>
    %12 = tpu.matmul %10, %11, %cst_10 {dimension_numbers = #tpu.dot_dimension_numbers<[1], [0], [0], [1], [0, 0, 1, 1], [], []>} : vector<8x128xbf16>, vector<128x64xbf16>, vector<8x64xf32> -> vector<8x64xf32>
    %c0_11 = arith.constant 0 : index
    %c0_12 = arith.constant 0 : index
    %13 = vector.load %arg6[%c0_11, %c0_12] : memref<1x64xf32, #tpu.memory_space<vmem>>, vector<1x64xf32>
    %14 = vector.broadcast %13 : vector<1x64xf32> to vector<8x64xf32>
    %15 = arith.addf %12, %14 : vector<8x64xf32>
    %cst_13 = arith.constant 0.000000e+00 : f32
    %16 = vector.broadcast %cst_13 : f32 to vector<8x64xf32>
    %17 = arith.maximumf %15, %16 : vector<8x64xf32>
    %18 = arith.truncf %17 : vector<8x64xf32> to vector<8x64xbf16>
    %c0_14 = arith.constant 0 : index
    %c0_15 = arith.constant 0 : index
    %19 = vector.load %arg7[%c0_14, %c0_15] : memref<64x16xbf16, #tpu.memory_space<vmem>>, vector<64x16xbf16>
    %cst_16 = arith.constant dense<0.000000e+00> : vector<8x16xf32>
    %20 = tpu.matmul %18, %19, %cst_16 {dimension_numbers = #tpu.dot_dimension_numbers<[1], [0], [0], [1], [0, 0, 1, 1], [], []>} : vector<8x64xbf16>, vector<64x16xbf16>, vector<8x16xf32> -> vector<8x16xf32>
    %c0_17 = arith.constant 0 : index
    %c0_18 = arith.constant 0 : index
    %21 = vector.load %arg8[%c0_17, %c0_18] : memref<1x16xf32, #tpu.memory_space<vmem>>, vector<1x16xf32>
    %22 = vector.broadcast %21 : vector<1x16xf32> to vector<8x16xf32>
    %23 = arith.addf %20, %22 : vector<8x16xf32>
    %24 = vector.extract_strided_slice %23 {offsets = [0, 0], sizes = [8, 8], strides = [1, 1]} : vector<8x16xf32> to vector<8x8xf32>
    %25 = vector.extract_strided_slice %23 {offsets = [0, 8], sizes = [8, 8], strides = [1, 1]} : vector<8x16xf32> to vector<8x8xf32>
    %cst_19 = arith.constant 5.000000e-01 : f32
    %26 = vector.broadcast %cst_19 : f32 to vector<8x8xf32>
    %27 = arith.mulf %26, %25 : vector<8x8xf32>
    %28 = math.exp %27 : vector<8x8xf32>
    %29 = arith.mulf %1, %28 : vector<8x8xf32>
    %30 = arith.addf %24, %29 : vector<8x8xf32>
    %31 = arith.truncf %30 : vector<8x8xf32> to vector<8x8xbf16>
    %c0_20 = arith.constant 0 : index
    %c0_21 = arith.constant 0 : index
    %32 = vector.load %arg9[%c0_20, %c0_21] : memref<8x64xbf16, #tpu.memory_space<vmem>>, vector<8x64xbf16>
    %cst_22 = arith.constant dense<0.000000e+00> : vector<8x64xf32>
    %33 = tpu.matmul %31, %32, %cst_22 {dimension_numbers = #tpu.dot_dimension_numbers<[1], [0], [0], [1], [0, 0, 1, 1], [], []>} : vector<8x8xbf16>, vector<8x64xbf16>, vector<8x64xf32> -> vector<8x64xf32>
    %c0_23 = arith.constant 0 : index
    %c0_24 = arith.constant 0 : index
    %34 = vector.load %arg10[%c0_23, %c0_24] : memref<1x64xf32, #tpu.memory_space<vmem>>, vector<1x64xf32>
    %35 = vector.broadcast %34 : vector<1x64xf32> to vector<8x64xf32>
    %36 = arith.addf %33, %35 : vector<8x64xf32>
    %cst_25 = arith.constant 0.000000e+00 : f32
    %37 = vector.broadcast %cst_25 : f32 to vector<8x64xf32>
    %38 = arith.maximumf %36, %37 : vector<8x64xf32>
    %39 = arith.truncf %38 : vector<8x64xf32> to vector<8x64xbf16>
    %c0_26 = arith.constant 0 : index
    %c0_27 = arith.constant 0 : index
    %40 = vector.load %arg11[%c0_26, %c0_27] : memref<64x128xbf16, #tpu.memory_space<vmem>>, vector<64x128xbf16>
    %cst_28 = arith.constant dense<0.000000e+00> : vector<8x128xf32>
    %41 = tpu.matmul %39, %40, %cst_28 {dimension_numbers = #tpu.dot_dimension_numbers<[1], [0], [0], [1], [0, 0, 1, 1], [], []>} : vector<8x64xbf16>, vector<64x128xbf16>, vector<8x128xf32> -> vector<8x128xf32>
    %c0_29 = arith.constant 0 : index
    %c0_30 = arith.constant 0 : index
    %42 = vector.load %arg12[%c0_29, %c0_30] : memref<1x128xf32, #tpu.memory_space<vmem>>, vector<1x128xf32>
    %43 = vector.broadcast %42 : vector<1x128xf32> to vector<8x128xf32>
    %44 = arith.addf %41, %43 : vector<8x128xf32>
    %cst_31 = arith.constant 0.000000e+00 : f32
    %45 = vector.broadcast %cst_31 : f32 to vector<8x128xf32>
    %46 = arith.maximumf %44, %45 : vector<8x128xf32>
    %47 = arith.truncf %46 : vector<8x128xf32> to vector<8x128xbf16>
    %c0_32 = arith.constant 0 : index
    %c0_33 = arith.constant 0 : index
    %48 = vector.load %arg13[%c0_32, %c0_33] : memref<128x16xbf16, #tpu.memory_space<vmem>>, vector<128x16xbf16>
    %cst_34 = arith.constant dense<0.000000e+00> : vector<8x16xf32>
    %49 = tpu.matmul %47, %48, %cst_34 {dimension_numbers = #tpu.dot_dimension_numbers<[1], [0], [0], [1], [0, 0, 1, 1], [], []>} : vector<8x128xbf16>, vector<128x16xbf16>, vector<8x16xf32> -> vector<8x16xf32>
    %c0_35 = arith.constant 0 : index
    %c0_36 = arith.constant 0 : index
    %50 = vector.load %arg14[%c0_35, %c0_36] : memref<1x16xf32, #tpu.memory_space<vmem>>, vector<1x16xf32>
    %51 = vector.broadcast %50 : vector<1x16xf32> to vector<8x16xf32>
    %52 = arith.addf %49, %51 : vector<8x16xf32>
    %53 = math.tanh %52 : vector<8x16xf32>
    %54 = tpu.concatenate %53, %23 in 1 : vector<8x16xf32>, vector<8x16xf32> -> vector<8x32xf32>
    %c0_37 = arith.constant 0 : index
    %c0_38 = arith.constant 0 : index
    %55 = vector.load %arg15[%c0_37, %c0_38] : memref<8x32xf32, #tpu.memory_space<vmem>>, vector<8x32xf32>
    tpu.vector_store %arg15[%c0_37, %c0_38], %54 {strides = array<i32>} : memref<8x32xf32, #tpu.memory_space<vmem>>, vector<8x32xf32>,
    return
  }
  func.func @transform_0(%arg0: i32) -> (i32, i32) {
    %c0_i32 = arith.constant 0 : i32
    %c0_i32_0 = arith.constant 0 : i32
    return %arg0, %c0_i32 : i32, i32
  }
  func.func @transform_1(%arg0: i32) -> (i32, i32) {
    %c0_i32 = arith.constant 0 : i32
    %c0_i32_0 = arith.constant 0 : i32
    return %arg0, %c0_i32 : i32, i32
  }
  func.func @transform_2(%arg0: i32) -> (i32, i32) {
    %c0_i32 = arith.constant 0 : i32
    %c0_i32_0 = arith.constant 0 : i32
    %c0_i32_1 = arith.constant 0 : i32
    return %c0_i32, %c0_i32_0 : i32, i32
  }
  func.func @transform_3(%arg0: i32) -> (i32, i32) {
    %c0_i32 = arith.constant 0 : i32
    %c0_i32_0 = arith.constant 0 : i32
    %c0_i32_1 = arith.constant 0 : i32
    return %c0_i32, %c0_i32_0 : i32, i32
  }
  func.func @transform_4(%arg0: i32) -> (i32, i32) {
    %c0_i32 = arith.constant 0 : i32
    %c0_i32_0 = arith.constant 0 : i32
    %c0_i32_1 = arith.constant 0 : i32
    return %c0_i32, %c0_i32_0 : i32, i32
  }
  func.func @transform_5(%arg0: i32) -> (i32, i32) {
    %c0_i32 = arith.constant 0 : i32
    %c0_i32_0 = arith.constant 0 : i32
    %c0_i32_1 = arith.constant 0 : i32
    return %c0_i32, %c0_i32_0 : i32, i32
  }
  func.func @transform_6(%arg0: i32) -> (i32, i32) {
    %c0_i32 = arith.constant 0 : i32
    %c0_i32_0 = arith.constant 0 : i32
    %c0_i32_1 = arith.constant 0 : i32
    return %c0_i32, %c0_i32_0 : i32, i32
  }
  func.func @transform_7(%arg0: i32) -> (i32, i32) {
    %c0_i32 = arith.constant 0 : i32
    %c0_i32_0 = arith.constant 0 : i32
    %c0_i32_1 = arith.constant 0 : i32
    return %c0_i32, %c0_i32_0 : i32, i32
  }
  func.func @transform_8(%arg0: i32) -> (i32, i32) {
    %c0_i32 = arith.constant 0 : i32
    %c0_i32_0 = arith.constant 0 : i32
    %c0_i32_1 = arith.constant 0 : i32
    return %c0_i32, %c0_i32_0 : i32, i32
  }
  func.func @transform_9(%arg0: i32) -> (i32, i32) {
    %c0_i32 = arith.constant 0 : i32
    %c0_i32_0 = arith.constant 0 : i32
    %c0_i32_1 = arith.constant 0 : i32
    return %c0_i32, %c0_i32_0 : i32, i32
  }
  func.func @transform_10(%arg0: i32) -> (i32, i32) {
    %c0_i32 = arith.constant 0 : i32
    %c0_i32_0 = arith.constant 0 : i32
    %c0_i32_1 = arith.constant 0 : i32
    return %c0_i32, %c0_i32_0 : i32, i32
  }
  func.func @transform_11(%arg0: i32) -> (i32, i32) {
    %c0_i32 = arith.constant 0 : i32
    %c0_i32_0 = arith.constant 0 : i32
    %c0_i32_1 = arith.constant 0 : i32
    return %c0_i32, %c0_i32_0 : i32, i32
  }
  func.func @transform_12(%arg0: i32) -> (i32, i32) {
    %c0_i32 = arith.constant 0 : i32
    %c0_i32_0 = arith.constant 0 : i32
    %c0_i32_1 = arith.constant 0 : i32
    return %c0_i32, %c0_i32_0 : i32, i32
  }
  func.func @transform_13(%arg0: i32) -> (i32, i32) {
    %c0_i32 = arith.constant 0 : i32
    %c0_i32_0 = arith.constant 0 : i32
    %c0_i32_1 = arith.constant 0 : i32
    return %c0_i32, %c0_i32_0 : i32, i32
  }
  func.func @transform_14(%arg0: i32) -> (i32, i32) {
    %c0_i32 = arith.constant 0 : i32
    %c0_i32_0 = arith.constant 0 : i32
    return %arg0, %c0_i32 : i32, i32
  }
}

</mosaic_0001>

<bundles_post_ra>
// kernel: tpu_custom_call.1
= control target key start
LH: loop header
LB: loop body
LE: loop exit
PB: predicated region body
PF: predicated region fallthrough
CT: control target
= control target key end

     0   :  { %vm64_vm0 = vcmask 130048   ;;  %s771_s0 = inlined_call_operand.vmem [shape: f32[8,16], index: 0, kind: input, shape index: {}]   ;;  %s772_s1 = inlined_call_operand.vmem [shape: f32[8,8], index: 1, kind: input, shape index: {}]   ;;  %s773_s2 = inlined_call_operand.vmem [shape: bf16[16,128], index: 2, kind: input, shape index: {}]   ;;  %s774_s3 = inlined_call_operand.vmem [shape: f32[1,128], index: 3, kind: input, shape index: {}]   ;;  %s775_s4 = inlined_call_operand.vmem [shape: bf16[128,64], index: 4, kind: input, shape index: {}]   ;;  %s776_s5 = inlined_call_operand.vmem [shape: f32[1,64], index: 5, kind: input, shape index: {}]   ;;  %s777_s6 = inlined_call_operand.vmem [shape: bf16[64,16], index: 6, kind: input, shape index: {}]   ;;  %s778_s7 = inlined_call_operand.vmem [shape: f32[1,16], index: 7, kind: input, shape index: {}]   ;;  %s779_s8 = inlined_call_operand.vmem [shape: bf16[8,64], index: 8, kind: input, shape index: {}]   ;;  %s780_s9 = inlined_call_operand.vmem [shape: f32[1,64], index: 9, kind: input, shape index: {}]   ;;  %s781_s10 = inlined_call_operand.vmem [shape: bf16[64,128], index: 10, kind: input, shape index: {}]   ;;  %s782_s11 = inlined_call_operand.vmem [shape: f32[1,128], index: 11, kind: input, shape index: {}]   ;;  %s783_s12 = inlined_call_operand.vmem [shape: bf16[128,16], index: 12, kind: input, shape index: {}]   ;;  %s784_s13 = inlined_call_operand.vmem [shape: f32[1,16], index: 13, kind: input, shape index: {}]   ;;  %s785_s14 = inlined_call_operand.hbm [shape: f32[8,32], index: 14, kind: output, shape index: {}]  }
   0x1   :  { %v520_v0 = vld [vmem:[%s773_s2] sm:$0xff]  ;;  %v528_v2 = vld [vmem:[%s775_s4 + $0x38] sm:$0xff]  ;;  %v527_v4 = vld [vmem:[%s775_s4 + $0x30] sm:$0xff] }
   0x2   :  { %v49_v1 = vld [vmem:[%s771_s0] sm:$0xff]  ;;  %75 = vmatpush.bf16.msra.mxu0 %v520_v0  ;;  %151 = vmatpush.bf16.msra.mxu1 %v528_v2 }
   0x3   :  { %v51_v3 = vpack.c.bf16 %v49_v1, %v49_v1 }
   0x5   :  { %420 = vmatmul.msk.bf16.vlgmr.msra.gmra.mxu0 %vm64_vm0, %v51_v3 }
   0x6   :  { %19 = vsyncpa [#allocation3], 0  ;;  %152 = vmatpush.bf16.msra.mxu1 %v527_v4  ;;  %v526_v5 = vld [vmem:[%s775_s4 + $0x28] sm:$0xff]  ;;  %v525_v6 = vld [vmem:[%s775_s4 + $0x20] sm:$0xff]  ;;  %vm202_vm1 = vcmask 523264   ;;  %vm238_vm2 = vcmask 1043456  }
   0x7   :  { %v524_v7 = vld [vmem:[%s775_s4 + $0x18] sm:$0xff]  ;;  %v523_v8 = vld [vmem:[%s775_s4 + $0x10] sm:$0xff]  ;;  %v522_v9 = vld [vmem:[%s775_s4 + $0x8] sm:$0xff]  ;;  %s585_s26 = smov 16   ;;  %vm234_vm3 = vcmask 64512   ;;  %s586_s30 = smov [#allocation2]  }
   0x8   :  { %v521_v10 = vld [vmem:[%s775_s4] sm:$0xff]  ;;  %v532_v11 = vld [vmem:[%s777_s6 + $0x18] sm:$0xff]  ;;  %v531_v12 = vld [vmem:[%s777_s6 + $0x10] sm:$0xff]  ;;  %s407_s17 = sshll.u32 %s785_s14, 4  ;;  %vm398_vm4 = vcmask 261120   ;;  %s408_s17 = int_to_ptr.hbm [resolvable:$true] %s407_s17 }
   0x9   :  { %210 = vmatpush.bf16.msra.mxu2 %v532_v11  ;;  %v548_v13 = vld [vmem:[%s774_s3] ss:$0 sm:$0xff]  ;;  %v530_v19 = vld [vmem:[%s777_s6 + $0x8] sm:$0xff]  ;;  %v536_v36 = vld [vmem:[%s781_s10 + $0x18] sm:$0xff] }
   0xa   :  { %153 = vmatpush.bf16.msra.mxu1 %v526_v5  ;;  %v529_v20 = vld [vmem:[%s777_s6] sm:$0xff]  ;;  %300 = vmatpush.bf16.msrb.mxu0 %v536_v36  ;;  %v535_v37 = vld [vmem:[%s781_s10 + $0x10] sm:$0xff]  ;;  %v534_v38 = vld [vmem:[%s781_s10 + $0x8] sm:$0xff] }
   0xb   :  { %v549_v21 = vld [vmem:[%s776_s5] ss:$0 sm:$0xff]  ;;  %s584_s5 = smov 120   ;;  %v544_v45 = vld [vmem:[%s783_s12 + $0x38] sm:$0xff]  ;;  %v543_v46 = vld [vmem:[%s783_s12 + $0x30] sm:$0xff] }
   0xc   :  { %v229_v27 = vld [vmem:[%s779_s8] sm:$0xf]  ;;  %379 = vmatpush.bf16.msra.mxu3 %v544_v45  ;;  %v542_v47 = vld [vmem:[%s783_s12 + $0x28] sm:$0xff]  ;;  %v540_v49 = vld [vmem:[%s783_s12 + $0x18] sm:$0xff] }
   0xd   :  { %211 = vmatpush.bf16.msra.mxu2 %v531_v12  ;;  %v240_v28 = vsel %vm238_vm2, %v229_v27, 0  ;;  %v550_v29 = vld [vmem:[%s778_s7] ss:$0 sm:$0xff]  ;;  %v539_v50 = vld [vmem:[%s783_s12 + $0x10] sm:$0xff]  ;;  %v538_v57 = vld [vmem:[%s783_s12 + $0x8] sm:$0xff] }
   0xe   :  { %154 = vmatpush.bf16.msra.mxu1 %v525_v6  ;;  %301 = vmatpush.bf16.msrb.mxu0 %v535_v37  ;;  %v50_v39 = vld [vmem:[%s772_s1] sm:$0xff] }
   0xf   :  { %v533_v44 = vld [vmem:[%s781_s10] sm:$0xff] }
  0x10   :  { %380 = vmatpush.bf16.msra.mxu3 %v543_v46  ;;  %v541_v48 = vld [vmem:[%s783_s12 + $0x20] sm:$0xff] }
  0x11   :  { %212 = vmatpush.bf16.msra.mxu2 %v530_v19  ;;  %v551_v51 = vld [vmem:[%s780_s9] ss:$0 sm:$0xff] }
  0x12   :  { %155 = vmatpush.bf16.msra.mxu1 %v524_v7  ;;  %302 = vmatpush.bf16.msrb.mxu0 %v534_v38  ;;  %v537_v58 = vld [vmem:[%s783_s12] sm:$0xff]  ;;  %s405_s12 = sshll.u32 %s586_s30, 4  ;;  %s406_s12 = int_to_ptr.vmem [resolvable:$true] %s405_s12 }
  0x13   :  { %v552_v59 = vld [vmem:[%s782_s11] ss:$0 sm:$0xff] }
  0x14   :  { %381 = vmatpush.bf16.msra.mxu3 %v542_v47  ;;  %v553_v1 = vld [vmem:[%s784_s13] ss:$0 sm:$0xff] }
  0x15   :  { %213 = vmatpush.bf16.msra.mxu2 %v529_v20 }
  0x16   :  { %156 = vmatpush.bf16.msra.mxu1 %v523_v8  ;;  %303 = vmatpush.bf16.msrb.mxu0 %v533_v44 }
  0x18   :  { %382 = vmatpush.bf16.msra.mxu3 %v541_v48 }
  0x19   :  { %249 = vmatpush.bf16.msrb.mxu2 %v240_v28 }
  0x1a   :  { %157 = vmatpush.bf16.msra.mxu1 %v522_v9 }
  0x1c   :  { %383 = vmatpush.bf16.msra.mxu3 %v540_v49 }
  0x1e   :  { %158 = vmatpush.bf16.msra.mxu1 %v521_v10 }
  0x20   :  { %384 = vmatpush.bf16.msra.mxu3 %v539_v50 }
  0x24   :  { %385 = vmatpush.bf16.msra.mxu3 %v538_v57 }
  0x28   :  { %386 = vmatpush.bf16.msra.mxu3 %v537_v58 }
  0x82   :  { %v77_v14 = vpop.f32.mrf.mxu0 }
  0x83   :  { %v78_v15 = vadd.f32 %v548_v13, %v77_v14 }
  0x85   :  { %v81_v16 = vmax.f32 %v78_v15, 0.0 }
  0x87   :  { %v82_v17 = vpack.c.bf16 %v81_v16, %v81_v16 }
  0x89   :  { %159 = vmatmul.bf16.vlgmr.msra.gmra.mxu1 %v82_v17 }
  0x8a   :  { %v79_v18 = vpop.f32.mrf.mxu0 }
 0x106   :  { %v160_v22 = vpop.f32.mrf.mxu1 }
 0x107   :  { %v161_v23 = vadd.f32 %v549_v21, %v160_v22 }
 0x109   :  { %v164_v24 = vmax.f32 %v161_v23, 0.0 }
 0x10b   :  { %v165_v25 = vpack.c.bf16 %v164_v24, %v164_v24 }
 0x10d   :  { %469 = vmatmul.msk.bf16.vlgmr.msra.gmra.mxu2 %vm202_vm1, %v165_v25 }
 0x10e   :  { %v162_v26 = vpop.f32.mrf.mxu1 }
 0x190   :  { %v215_v30 = vpop.f32.mrf.mxu2 }
 0x191   :  { %v216_v31 = vadd.f32 %v550_v29, %v215_v30 }
 0x193   :  { %v219_v32 = vmul.f32 0.5, %v216_v31 }
 0x195   :  { %v220_v33 = vmul.f32 1.442695, %v219_v32 }
 0x197   :  { %554 = vpow2.f32 %v220_v33 }
 0x198   :  { %v217_v34 = vpop.f32.mrf.mxu2 }
 0x19d   :  { %v555_v35 = vpop.eup %554 }
 0x19e   :  { %223 = vrot.lane.b32.xlu0 %v555_v35, %s584_s5 }
 0x1a6   :  { %394 = vrot.lane.b32.xlu0 %v216_v31, %s585_s26 }
 0x210   :  { %v224_v40 = vpop.permute.xlu0 %223 }
 0x211   :  { %v226_v41 = vmul.f32 %v224_v40, %v50_v39 }
 0x213   :  { %v227_v42 = vadd.f32 %v226_v41, %v216_v31 }
 0x215   :  { %v228_v43 = vpack.c.bf16 %v227_v42, %v227_v42 }
 0x217   :  { %470 = vmatmul.msk.bf16.vlgmr.msrb.gmra.mxu2 %vm234_vm3, %v228_v43 }
 0x218   :  { %v395_v6 = vpop.permute.xlu0 %394 }
 0x29a   :  { %v251_v52 = vpop.f32.mrf.mxu2 }
 0x29b   :  { %v252_v53 = vadd.f32 %v551_v51, %v251_v52 }
 0x29d   :  { %v255_v54 = vmax.f32 %v252_v53, 0.0 }
 0x29f   :  { %v256_v55 = vpack.c.bf16 %v255_v54, %v255_v54 }
 0x2a1   :  { %487 = vmatmul.msk.bf16.vlgmr.msrb.gmra.mxu0 %vm202_vm1, %v256_v55 }
 0x2a2   :  { %v253_v56 = vpop.f32.mrf.mxu2 }
 0x31e   :  { %v305_v60 = vpop.f32.mrf.mxu0 }
 0x31f   :  { %v306_v61 = vadd.f32 %v552_v59, %v305_v60 }
 0x321   :  { %v309_v62 = vmax.f32 %v306_v61, 0.0 }
 0x323   :  { %v310_v63 = vpack.c.bf16 %v309_v62, %v309_v62 }
 0x325   :  { %387 = vmatmul.bf16.vlgmr.msra.gmra.mxu3 %v310_v63 }
 0x326   :  { %v307_v0 = vpop.f32.mrf.mxu0 }
 0x3a8   :  { %v388_v2 = vpop.f32.mrf.mxu3 }
 0x3a9   :  { %v389_v3 = vadd.f32 %v553_v1, %v388_v2 }
 0x3ab   :  { %556 = vtanh.f32 %v389_v3 }
 0x3b0   :  { %v390_v4 = vpop.f32.mrf.mxu3 }
 0x3b1   :  { %v557_v5 = vpop.eup %556 }
 0x3b2   :  { %v397_v7 = vsel %vm64_vm0, %v557_v5, %v395_v6 }
 0x3b3   :  { %399 = vst.msk [vmem:[#allocation2] sm:$0xff] %vm398_vm4, %v397_v7 }
 0x3b4   :  { %410 = dma.vmem_to_hbm [thread:$0]  %s406_s12, 128, %s408_s17, [#allocation3]  }
 0x3b5   :  { %582 = dma.done.wait [#allocation3], 128  }
 0x3b6   :  { %583 = vsyncadd [#allocation3], 4294967168 }
 0x3b7   :  { %415 = vsyncpa [#allocation3], 1 }

</bundles_post_ra>
